<compile_context>
chip_gen: v6e
topology: v6e:2x2x1
jax: 0.10.0
libtpu: 0.0.40
codegen_flags: <defaults>
</compile_context>

<pallas_src>
import jax
import jax.numpy as jnp
from jax.experimental import pallas as pl
from jax.experimental.pallas import tpu as pltpu


def _learnable_bias_kernel(b_ref, x_ref, o_ref):
    # b_ref: (TC, 1)   x_ref / o_ref: (1, TC, THW)
    # (TC,1) broadcasts over batch and lane axes on the VPU.
    o_ref[...] = (x_ref[...] + b_ref[...]).astype(o_ref.dtype)


def learnable_bias(x, bias):
    """x: (N, C, H, W); bias: (1, C, 1, 1) -> out: (N, C, H, W) = x + bias."""
    N, C, H, W = x.shape
    HW = H * W
    dtype = x.dtype
    itemsize = jnp.dtype(dtype).itemsize

    x_flat = x.reshape(N, C, HW)
    # Pre-cast bias so the in-kernel add does not promote bf16 tiles to f32.
    b_flat = bias.reshape(C, 1).astype(dtype)

    # ---- tile selection ---------------------------------------------------
    # Lane axis (HW): multiple of 128, up to 2048 lanes per block.
    if HW % 128 == 0:
        thw = min(HW, 2048)
    else:
        # TODO(synk): for odd spatial sizes (e.g. 7x7=49) a lane-dense repack
        # would avoid masked partial stores; full-dim block keeps it correct.
        thw = HW
    # Sublane axis (C): multiple of 8 (16 for 2-byte dtypes), up to 128 rows.
    sub_align = 16 if itemsize == 2 else 8
    if C % sub_align == 0:
        tc = min(C, 128)
        tc -= tc % sub_align
    else:
        tc = C

    grid = (N, pl.cdiv(C, tc), pl.cdiv(HW, thw))

    # ---- VMEM budget (explicit, v7x-safe) ---------------------------------
    block_bytes = tc * thw * itemsize
    # double-buffered input block + double-buffered output block + bias block
    vmem_needed = 2 * block_bytes + 2 * block_bytes + 2 * tc * itemsize
    vmem_limit = int(min(max(2 * vmem_needed, 16 * 1024 * 1024),
                         48 * 1024 * 1024))

    cost = pl.CostEstimate(
        flops=N * C * HW,
        transcendentals=0,
        bytes_accessed=2 * N * C * HW * itemsize + C * itemsize,
    )

    out = pl.pallas_call(
        _learnable_bias_kernel,
        out_shape=jax.ShapeDtypeStruct((N, C, HW), dtype),
        grid_spec=pltpu.PrefetchScalarGridSpec(
            num_scalar_prefetch=0,
            grid=grid,
            in_specs=[
                # bias tile for the current C-tile (tiny, effectively resident)
                pl.BlockSpec((tc, 1), lambda n, ci, hi: (ci, 0)),
                # x tile
                pl.BlockSpec((1, tc, thw), lambda n, ci, hi: (n, ci, hi)),
            ],
            out_specs=pl.BlockSpec((1, tc, thw), lambda n, ci, hi: (n, ci, hi)),
        ),
        compiler_params=pltpu.CompilerParams(
            dimension_semantics=("parallel", "parallel", "parallel"),
            vmem_limit_bytes=vmem_limit,
        ),
        cost_estimate=cost,
    )(b_flat, x_flat)

    return out.reshape(N, C, H, W)


def _check(key, shape, dtype):
    kx, kb = jax.random.split(key)
    N, C, H, W = shape
    x = jax.random.normal(kx, (N, C, H, W), dtype=jnp.float32).astype(dtype)
    bias = jax.random.normal(kb, (1, C, 1, 1), dtype=jnp.float32).astype(dtype)

    out = jax.block_until_ready(learnable_bias(x, bias))
    ref = x + bias  # reference: x + bias.expand_as(x)

    assert out.shape == x.shape
    tol = 1e-6 if dtype == jnp.float32 else 1e-2
    assert jnp.allclose(out.astype(jnp.float32), ref.astype(jnp.float32),
                        atol=tol, rtol=tol), f"mismatch vs reference {shape} {dtype}"


if __name__ == "__main__":
    key = jax.random.PRNGKey(0)
    k0, k1, k2 = jax.random.split(key, 3)

    # Primary spec-consistent shape.
    _check(k0, (2, 4, 16, 16), jnp.float32)
    # Non-aligned spatial / channel dims (exercises full-dim fallback blocks).
    _check(k1, (2, 6, 7, 7), jnp.float32)
    # bf16 path (16-aligned channels, lane-dense HW tile).
    _check(k2, (2, 16, 16, 16), jnp.bfloat16)

    print("KERNEL_OK")
</pallas_src>

<mosaic_0001>
module attributes {stable_mosaic.version = 11 : i64} {
  func.func @_learnable_bias_kernel(%arg0: i32, %arg1: i32, %arg2: i32, %arg3: memref<4x1xf32, #tpu.memory_space<vmem>>, %arg4: memref<1x4x256xf32, #tpu.memory_space<vmem>>, %arg5: memref<1x4x256xf32, #tpu.memory_space<vmem>>) attributes {dimension_semantics = [#tpu.dimension_semantics<parallel>, #tpu.dimension_semantics<parallel>, #tpu.dimension_semantics<parallel>], iteration_bounds = array<i64: 2, 1, 1>, scalar_prefetch = 0 : i64, scratch_operands = 0 : i64, tpu.core_type = #tpu.core_type<tc>, window_params = [{transform_indices = @transform_0, window_bounds = array<i64: 4, 1>}, {transform_indices = @transform_1, window_bounds = array<i64: 1, 4, 256>}, {transform_indices = @transform_2, window_bounds = array<i64: 1, 4, 256>}]} {
    %c0 = arith.constant 0 : index
    %c0_0 = arith.constant 0 : index
    %c0_1 = arith.constant 0 : index
    %0 = vector.load %arg4[%c0, %c0_0, %c0_1] : memref<1x4x256xf32, #tpu.memory_space<vmem>>, vector<1x4x256xf32>
    %c0_2 = arith.constant 0 : index
    %c0_3 = arith.constant 0 : index
    %1 = vector.load %arg3[%c0_2, %c0_3] : memref<4x1xf32, #tpu.memory_space<vmem>>, vector<4x1xf32>
    %2 = vector.shape_cast %1 : vector<4x1xf32> to vector<1x4x1xf32>
    %3 = vector.broadcast %2 : vector<1x4x1xf32> to vector<1x4x256xf32>
    %4 = arith.addf %0, %3 : vector<1x4x256xf32>
    %c0_4 = arith.constant 0 : index
    %c0_5 = arith.constant 0 : index
    %c0_6 = arith.constant 0 : index
    %5 = vector.load %arg5[%c0_4, %c0_5, %c0_6] : memref<1x4x256xf32, #tpu.memory_space<vmem>>, vector<1x4x256xf32>
    tpu.vector_store %arg5[%c0_4, %c0_5, %c0_6], %4 {strides = array<i32>} : memref<1x4x256xf32, #tpu.memory_space<vmem>>, vector<1x4x256xf32>,
    return
  }
  func.func @transform_0(%arg0: i32, %arg1: i32, %arg2: i32) -> (i32, i32) {
    %c0_i32 = arith.constant 0 : i32
    %c0_i32_0 = arith.constant 0 : i32
    return %arg1, %c0_i32 : i32, i32
  }
  func.func @transform_1(%arg0: i32, %arg1: i32, %arg2: i32) -> (i32, i32, i32) {
    %c0_i32 = arith.constant 0 : i32
    return %arg0, %arg1, %arg2 : i32, i32, i32
  }
  func.func @transform_2(%arg0: i32, %arg1: i32, %arg2: i32) -> (i32, i32, i32) {
    %c0_i32 = arith.constant 0 : i32
    return %arg0, %arg1, %arg2 : i32, i32, i32
  }
}

</mosaic_0001>

<bundles_post_ra>
// kernel: tpu_custom_call.1
= control target key start
LH: loop header
LB: loop body
LE: loop exit
PB: predicated region body
PF: predicated region fallthrough
CT: control target
= control target key end

     0   :  { %7 = vsyncpa [#allocation3], 0  ;;  %s700_s0 = inlined_call_operand.vmem [shape: f32[4,1], index: 0, kind: input, shape index: {}]   ;;  %s701_s1 = inlined_call_operand.hbm [shape: f32[2,4,256], index: 1, kind: input, shape index: {}]   ;;  %s702_s2 = inlined_call_operand.hbm [shape: f32[2,4,256], index: 2, kind: output, shape index: {}]  }
   0x1   :  { %9 = vsyncpa [#allocation3 + $0x1], 0 }
   0x2   :  { %10 = vsyncpa [#allocation4], 0 }
   0x3   :  { %12 = vsyncpa [#allocation4 + $0x1], 0  ;;  %s563_s9 = smov 0   ;;  %s565_s10 = smov 0  }
   0x4   :  { %s567_s11 = smov 0   ;;  %s569_s12 = smov 0  }
   0x5   :  { %s571_s13 = smov 0   ;;  %s573_s14 = smov 0  }
   0x6 LB: > { %s351_s15 = sadd.s32 4294967295, %s542_s14   ;;  %s352_s16 = sadd.s32 4294967294, %s542_s14   ;;  %s542_s14 = sphi %s573_s14, %s18_s14   ;;  %s538_s13 = sphi %s571_s13, %s714_s13   ;;  %s534_s12 = sphi %s569_s12, %s713_s12   ;;  %s530_s11 = sphi %s567_s11, %s712_s11   ;;  %s526_s10 = sphi %s565_s10, %s711_s10   ;;  %s522_s9 = sphi %s563_s9, %s710_s9  }
   0x7   : > { %s37_s17 = sadd.s32 1, %s538_s13  ;;  %s74_s18 = sadd.s32 1, %s530_s11 }
   0x8   : > { %p39_p0 = scmp.ge.s32.totalorder %s37_s17, 2  ;;  %p81_p1 = scmp.ne.s32.totalorder %s530_s11, %s526_s10 }
   0x9   : > { %p82_p2 = scmp.eq.s32.totalorder %s542_s14, 0  ;;  %p87_p3 = scmp.ne.s32.totalorder %s526_s10, %s522_s9 }
   0xa   : > { %s716_s17 = smov (%p39_p0, %s37_s17), 0  ;;  %p88_p5 = scmp.eq.s32.totalorder %s351_s15, 0 }
   0xb   : > { %p604_p4 = por %p82_p2, %p81_p1  ;;  %s67_s20 = ssub.s32 %s538_s13, %s716_s17 }
   0xc   : > { %p115_p6 = scmp.eq.s32.totalorder %s351_s15, 1  ;;  %p72_p7 = scmp.eq.s32.totalorder %s67_s20, 0 }
   0xd   : > { %p610_p8 = por %p88_p5, %p87_p3  ;;  %p121_p10 = scmp.eq.s32.totalorder %s352_s16, 1 }
   0xe   : > { %p614_p9 = por %p115_p6, %p81_p1  ;;  %p381_p13 = scmp.lt.s32.totalorder %s542_s14, 2 }
   0xf   : > { %s619_s23 = scalar_select %p72_p7, %s530_s11, %s74_s18  }
  0x10   : > { %p621_p11 = por %p121_p10, %p87_p3  ;;  %s148_s25 = sand.u32 1, %s530_s11  }
  0x11   : > { %s356_s26 = sshll.u32 %s148_s25, 3  ;;  %s367_s27 = sshll.u32 %s538_s13, 7 }
  0x12   : > { %s706_s24 = scalar_select %p621_p11, 1, 0 }
  0x13   : > { %s162_s30 = scalar_lea.hbm %s701_s1, %s367_s27  ;;  %s152_s3 = scalar_lea.vmem [#allocation2], %s356_s26 }
  0x14   : > { %s164_s4 = sshll.u32 %s152_s3, 4  ;;  %p634_p0 = pnand %p381_p13, %p604_p4  ;;  %s165_s4 = int_to_ptr.vmem [resolvable:$true] %s164_s4 }
  0x15   : > { %p359_p1 = scmp.ge.s32.totalorder %s542_s14, 1  ;;  %p169_p2 = scmp.lt.s32.totalorder %s542_s14, 3 }
  0x16   : > { %s149_s6 = scalar_lea.sflag [#allocation3], %s148_s25  ;;  %p436_p3 = pneg %p634_p0 }
  0x17   : > { %s447_s7 = scalar_lea.vmem %s165_s4, 128  ;;  %s544_s8 = smov [#allocation2]  }
  0x18   : > { %p448_p5 = scmp.ne.s32.totalorder %s165_s4, %s447_s7  ;;  %s452_s15 = sshll.u32 %s544_s8, 4  ;;  %s453_s15 = int_to_ptr.vmem [resolvable:$false] %s452_s15 }
  0x19   : > { %s454_s16 = scalar_lea.vmem %s453_s15, 256  ;;  %p455_p10 = scmp.lt.s32.totalorder %s165_s4, %s453_s15 }
  0x1a   : > { %p450_p6 = pnand %p448_p5, %p436_p3  ;;  %p456_p12 = scmp.lt.s32.totalorder %s454_s16, %s447_s7 }
  0x1c   : > { %p451_p7 = pneg %p450_p6  ;;  %p457_p4 = por %p456_p12, %p455_p10 }
  0x1e   : > { %p458_p13 = pnand %p457_p4, %p451_p7 }
  0x20   : > { %461 = shalt.err (!%p458_p13)
}
  0x21   : > { %376 = dma.hbm_to_vmem [thread:$0]  (!%p634_p0), %s162_s30, 128, %s165_s4, %s149_s6  }
  0x22   : > { %p170_p11 = pnand %p359_p1, %p169_p2 }
  0x23   : > { %s649_s18 = sand.u32 (!%p170_p11), 1, %s526_s10  }
  0x24   : > { %173 = sbr.rel (%p170_p11) target bundleno = 185 (0xb9), region = 28  ;;  %s360_s19 = sshll.u32 (!%p170_p11), %s649_s18, 3 }
  0x25   : > { %s176_s20 = scalar_lea.sflag (!%p170_p11), [#allocation3], %s649_s18  ;;  %s179_s25 = scalar_lea.vmem (!%p170_p11), [#allocation2], %s360_s19 }
  0x29   : > { %513 = dma.done.wait (%p610_p8), %s176_s20, 128  }
  0x2a   : > { %515 = vsyncadd (%p610_p8), %s176_s20, 4294967168  ;;  %v545_v0 = vmov 0   ;;  %v211_v1 = vld [vmem:[%s700_s0] sm:$0xf]  ;;  %v546_v2 = vmov 839922192   ;;  %v219_v4 = vlaneseq }
  0x2b   : > { %433 = vset.pattern.permute.xlu0 %v545_v0  ;;  %v217_v3 = vunpack.c.l.s4 %v546_v2  ;;  %v210_v9 = vld [vmem:[%s179_s25] sm:$0xff]  ;;  %s368_s21 = sshll.u32 %s534_s12, 7  ;;  %s203_s28 = scalar_lea.vmem [#allocation5], %s360_s19 }
  0x2c   : > { %214 = vperm.xlu0 %433, %v211_v1   ;;  %v220_v6 = vshrl.u32 %v219_v4, 7  ;;  %s245_s29 = sshll.u32 %s203_s28, 4  ;;  %s243_s4 = scalar_lea.hbm %s702_s2, %s368_s21  ;;  %s246_s29 = int_to_ptr.vmem [resolvable:$true] %s245_s29 }
  0x2d   : > { %v218_v5 = vunpack.c.0.s8 %v217_v3  ;;  %s227_s5 = scalar_lea.sflag [#allocation4], %s649_s18  ;;  %s462_s6 = scalar_lea.vmem %s246_s29, 128 }
  0x2e   : > { %p463_p8 = scmp.ne.s32.totalorder %s246_s29, %s462_s6  ;;  %s547_s7 = smov [#allocation5]  }
  0x2f   : > { %v221_v7 = vsub.s32 %v218_v5, %v220_v6  ;;  %s466_s8 = sshll.u32 %s547_s7, 4  ;;  %s467_s8 = int_to_ptr.vmem [resolvable:$false] %s466_s8 }
  0x30   : > { %p464_p11 = pnand %p463_p8, %p614_p9  ;;  %s468_s12 = scalar_lea.vmem %s467_s8, 256 }
  0x31   : > { %p469_p0 = scmp.lt.s32.totalorder %s246_s29, %s467_s8  ;;  %p470_p1 = scmp.lt.s32.totalorder %s468_s12, %s462_s6 }
  0x32   : > { %p465_p12 = pneg %p464_p11 }
  0x33   : > { %p471_p2 = por %p470_p1, %p469_p0 }
  0x35   : > { %p472_p3 = pnand %p471_p2, %p465_p12 }
  0xa7   : > { %v215_v8 = vpop.permute.xlu0 %214 }
  0xa8   : > { %v222_v10 = vrot.slane %v215_v8, %v221_v7 }
  0xaa   : > { %v224_v11 = vadd.f32 %v222_v10, %v210_v9 }
  0xac   : > { %225 = vst [vmem:[%s203_s28] sm:$0xff] %v224_v11 }
  0xad   : > { %475 = shalt.err (!%p472_p3)
}
  0xae   : > { %s476_s15 = scalar_lea.hbm %s243_s4, 128  ;;  %s480_s19 = scalar_lea.hbm %s702_s2, 256 }
  0xaf   : > { %p477_p5 = scmp.ne.s32.totalorder %s243_s4, %s476_s15  ;;  %p481_p10 = scmp.lt.s32.totalorder %s243_s4, %s702_s2 }
  0xb0   : > { %p482_p4 = scmp.lt.s32.totalorder %s480_s19, %s476_s15 }
  0xb1   : > { %p478_p6 = pnand %p477_p5, %p614_p9 }
  0xb2   : > { %p483_p13 = por %p482_p4, %p481_p10 }
  0xb3   : > { %p479_p7 = pneg %p478_p6 }
  0xb5   : > { %p484_p8 = pnand %p483_p13, %p479_p7 }
  0xb7   : > { %487 = shalt.err (!%p484_p8)
}
  0xb8   : > { %371 = dma.vmem_to_hbm [thread:$0]  (%p614_p9), %s246_s29, 128, %s243_s4, %s227_s5  }
  0xb9 PF: > { %s257_s26 = sand.u32 1, %s522_s9   ;;  %p708_p11 = scmp.ne.s32.totalorder %s706_s24, 0 }
  0xba   : > { %p709_p12 = scmp.ge.s32.totalorder %s542_s14, 2  ;;  %s258_s27 = scalar_lea.sflag [#allocation4], %s257_s26 }
  0xbc   : > { %p378_p0 = pnand %p709_p12, %p708_p11 }
  0xbe   : > { %p379_p1 = pneg %p378_p0 }
  0xc0   : > { %517 = dma.done.wait (%p379_p1), %s258_s27, 128  }
  0xc1   : > { %519 = vsyncadd (%p379_p1), %s258_s27, 4294967168  ;;  %s18_s14 = sadd.s32 1, %s542_s14   ;;  %s710_s9 = smov %s526_s10 }
  0xc2   : > { %p15_p2 = scmp.ge.s32.totalorder %s18_s14, 4   ;;  %s711_s10 = smov %s530_s11 }
  0xc3   : > { %s712_s11 = smov %s619_s23  ;;  %s713_s12 = smov %s538_s13 }
  0xc4   : > { %s714_s13 = smov %s716_s17  ;;  %17 = sbr.rel (!%p15_p2) target bundleno = 6 (0x6), region = 76 }
  0xc9   :  { %263 = vsyncpa [#allocation3], 1 }
  0xca   :  { %265 = vsyncpa [#allocation3 + $0x1], 1 }
  0xcb   :  { %266 = vsyncpa [#allocation4], 1 }
  0xcc   :  { %268 = vsyncpa [#allocation4 + $0x1], 1 }

</bundles_post_ra>
